<compile_context>
chip_gen: v6e
topology: v6e:2x2x1
jax: 0.10.0
libtpu: 0.0.40
codegen_flags: <defaults>
</compile_context>

<pallas_src>
import functools

import jax
import jax.numpy as jnp
from jax.experimental import pallas as pl
from jax.experimental.pallas import tpu as pltpu

EPS = 1e-5


def _style_loss_kernel(x_ref, t_ref, o_ref, xs, xq, ts, tq, *,
                       nc, hw, tm, hw_tile, num_hw_blocks, use_mxu):
    """x_ref/t_ref: (tm, hw_tile) tiles. o_ref: (1, 1, 128) per-row-block partials.

    Scratch:
      xs/ts: running sum   — (tm, 128) f32 when use_mxu (MXU accumulators),
                              else (tm, 1) f32.
      xq/tq: running sumsq — (tm, 1) f32.
    """
    i = pl.program_id(0)
    j = pl.program_id(1)

    @pl.when(j == 0)
    def _init():
        xs[...] = jnp.zeros_like(xs)
        xq[...] = jnp.zeros_like(xq)
        ts[...] = jnp.zeros_like(ts)
        tq[...] = jnp.zeros_like(tq)

    def _accum(x_in, t_in):
        # x_in/t_in are in the input dtype; any stale/garbage lanes have
        # already been zeroed by the caller (select, not multiply).
        x = x_in.astype(jnp.float32)
        t = t_in.astype(jnp.float32)
        if use_mxu:
            # Plain lane-sums on the idle MXU (bf16 in, f32 accumulate); every
            # output lane holds the identical row sum.
            ones = jnp.ones((hw_tile, 128), dtype=x_in.dtype)
            xs[...] += jnp.dot(x_in, ones, preferred_element_type=jnp.float32)
            ts[...] += jnp.dot(t_in, ones, preferred_element_type=jnp.float32)
        else:
            xs[...] += jnp.sum(x, axis=1, keepdims=True)
            ts[...] += jnp.sum(t, axis=1, keepdims=True)
        # Square + reduce stays on the VPU in f32 (precision; f32 MXU is slow).
        xq[...] += jnp.sum(x * x, axis=1, keepdims=True)
        tq[...] += jnp.sum(t * t, axis=1, keepdims=True)

    has_tail = (hw % hw_tile) != 0  # static

    if not has_tail:
        _accum(x_ref[...], t_ref[...])
    else:
        @pl.when(j != num_hw_blocks - 1)
        def _full():
            _accum(x_ref[...], t_ref[...])

        @pl.when(j == num_hw_blocks - 1)
        def _tail():
            # Zero the lanes past HW in the last spatial block; undefined VMEM
            # must never feed the running sums.
            tail_valid = hw - (num_hw_blocks - 1) * hw_tile  # static, in (0, hw_tile)
            lane = jax.lax.broadcasted_iota(jnp.int32, (tm, hw_tile), 1)
            m = lane < tail_valid
            zero = jnp.zeros((), dtype=x_ref.dtype)
            _accum(jnp.where(m, x_ref[...], zero), jnp.where(m, t_ref[...], zero))

    @pl.when(j == num_hw_blocks - 1)
    def _finalize():
        inv_hw = 1.0 / hw
        # Unbiased variance (ddof=1), matching torch .var(dim) default.
        inv_dof = 1.0 / (hw - 1) if hw > 1 else float("nan")

        if use_mxu:
            x_sum = xs[:, 0:1]          # all 128 lanes are identical row sums
            t_sum = ts[:, 0:1]
        else:
            x_sum = xs[...]
            t_sum = ts[...]

        x_mean = x_sum * inv_hw                                   # (tm, 1)
        t_mean = t_sum * inv_hw
        x_var = jnp.maximum(xq[...] - x_sum * x_mean, 0.0) * inv_dof + EPS
        t_var = jnp.maximum(tq[...] - t_sum * t_mean, 0.0) * inv_dof + EPS
        x_std = jnp.sqrt(x_var)
        t_std = jnp.sqrt(t_var)

        d_mean = x_mean - t_mean
        d_std = x_std - t_std
        contrib = d_mean * d_mean + d_std * d_std                 # (tm, 1)

        # Mask rows past NC (the ragged edge row block reads undefined VMEM).
        row = i * tm + jax.lax.broadcasted_iota(jnp.int32, (tm, 1), 0)
        contrib = jnp.where(row < nc, contrib, 0.0)

        # Partial (un-normalized) contribution of this row block to both MSEs,
        # written into a lane-padded (1, 1, 128) slab (lane 0 holds the value).
        tot = jnp.sum(contrib, axis=0, keepdims=True)             # (1, 1)
        lane = jax.lax.broadcasted_iota(jnp.int32, (1, 128), 1)
        o_ref[...] = jnp.where(lane == 0, tot, 0.0)[None].astype(jnp.float32)


def _vmem_capacity_bytes():
    """Physical VMEM per TensorCore; conservative (v7x) fallback if query fails."""
    try:
        return int(pltpu.get_tpu_info().vmem_capacity_bytes)
    except Exception:
        return 64 * 1024 * 1024


def _pick_tiles(nc, hw, itemsize, vmem_cap):
    """Choose (row tile, spatial tile, vmem_limit) — generation-aware budget."""
    # Spatial tile: full HW if it fits a 2048-wide tile, else a fixed
    # 128-aligned 2048-wide tile with a masked ragged tail (pl.cdiv blocks).
    HW_TILE_MAX = 2048
    hw_tile = hw if hw <= HW_TILE_MAX else HW_TILE_MAX

    if vmem_cap >= 96 * 1024 * 1024:
        # v5e / v6e: 128 MiB physical VMEM — size generously.
        budget = 32 * 1024 * 1024
        vmem_limit = 64 * 1024 * 1024
    else:
        # v7x: 64 MiB physical VMEM — leave headroom for cast temps + scratch.
        budget = 20 * 1024 * 1024
        vmem_limit = 48 * 1024 * 1024

    # Row tile: multiple of 8, sized so 2 inputs x 2 pipeline buffers <= budget.
    tm = budget // (4 * hw_tile * itemsize)
    tm = max(8, (tm // 8) * 8)
    tm = min(tm, 2048)

    if nc < 8:
        tm = nc                        # full-dim row block (no padding needed)
    else:
        tm = min(tm, (nc // 8) * 8)    # never exceed the array's row extent
        if nc >= 16:
            # Guarantee >= 2 row blocks so the "parallel" axis shards across
            # v7x's two TensorCores (per-TC HBM bandwidth).
            half = ((-(-nc // 2)) + 7) // 8 * 8
            tm = min(tm, half)
    return tm, hw_tile, vmem_limit


def style_loss(inp, tgt):
    assert inp.ndim == 4 and tgt.ndim == 4 and inp.shape == tgt.shape
    assert inp.dtype == tgt.dtype
    N, C, H, W = inp.shape
    NC, HW = N * C, H * W

    x = inp.reshape(NC, HW)   # contiguous reshape: no copy
    t = tgt.reshape(NC, HW)

    itemsize = jnp.dtype(inp.dtype).itemsize
    use_mxu = jnp.dtype(inp.dtype) in (jnp.dtype(jnp.bfloat16), jnp.dtype(jnp.float16))

    tm, hw_tile, vmem_limit = _pick_tiles(NC, HW, itemsize, _vmem_capacity_bytes())
    num_row_blocks = pl.cdiv(NC, tm)
    num_hw_blocks = pl.cdiv(HW, hw_tile)

    kernel = functools.partial(
        _style_loss_kernel, nc=NC, hw=HW, tm=tm, hw_tile=hw_tile,
        num_hw_blocks=num_hw_blocks, use_mxu=use_mxu)

    sum_shape = (tm, 128) if use_mxu else (tm, 1)
    scratch = [
        pltpu.VMEM(sum_shape, jnp.float32),   # xs
        pltpu.VMEM((tm, 1), jnp.float32),     # xq
        pltpu.VMEM(sum_shape, jnp.float32),   # ts
        pltpu.VMEM((tm, 1), jnp.float32),     # tq
    ]

    cost = pl.CostEstimate(
        flops=4 * NC * HW,
        transcendentals=2 * NC,
        bytes_accessed=2 * NC * HW * itemsize + num_row_blocks * 128 * 4,
    )

    # TODO(synk): sweep pipeline_mode=pl.Buffered(3) on the input specs once a
    # target generation is fixed (skipped: small gain, VMEM risk on v7x).
    partials = pl.pallas_call(
        kernel,
        out_shape=jax.ShapeDtypeStruct((num_row_blocks, 1, 128), jnp.float32),
        grid_spec=pltpu.PrefetchScalarGridSpec(
            num_scalar_prefetch=0,
            grid=(num_row_blocks, num_hw_blocks),
            in_specs=[
                pl.BlockSpec((tm, hw_tile), lambda i, j: (i, j)),
                pl.BlockSpec((tm, hw_tile), lambda i, j: (i, j)),
            ],
            out_specs=pl.BlockSpec((1, 1, 128), lambda i, j: (i, 0, 0)),
            scratch_shapes=scratch,
        ),
        compiler_params=pltpu.CompilerParams(
            dimension_semantics=("parallel", "arbitrary"),
            vmem_limit_bytes=vmem_limit,
        ),
        cost_estimate=cost,
    )(x, t)

    # Tiny epilogue: sum per-row-block partials and normalize by N*C (MSE mean).
    return jnp.sum(partials) / NC


def _style_loss_ref(inp, tgt):
    # Pure-JAX reference mirroring the PyTorch module (two-pass variance).
    def mean_std(f):
        n, c = f.shape[:2]
        flat = f.reshape(n, c, -1)
        var = jnp.var(flat, axis=2, ddof=1) + EPS
        return jnp.mean(flat, axis=2), jnp.sqrt(var)

    im, isd = mean_std(inp)
    tm_, tsd = mean_std(tgt)
    return jnp.mean((im - tm_) ** 2) + jnp.mean((isd - tsd) ** 2)


if __name__ == "__main__":
    key = jax.random.PRNGKey(0)
    k1, k2, k3, k4, k5, k6, k7, k8 = jax.random.split(key, 8)

    # 1) Primary check: shapes consistent with the module (batch=2, channels=4, 16x16).
    x = jax.random.normal(k1, (2, 4, 16, 16), dtype=jnp.float32)
    t = jax.random.normal(k2, (2, 4, 16, 16), dtype=jnp.float32) * 1.3 + 0.2
    out = jax.block_until_ready(style_loss(x, t))
    ref = _style_loss_ref(x, t)
    assert jnp.allclose(out, ref, rtol=1e-4, atol=1e-6), (out, ref)

    # 2) Ragged rows (NC=6) and non-128 spatial (HW=70) — no padding copies.
    x2 = jax.random.normal(k3, (2, 3, 10, 7), dtype=jnp.float32)
    t2 = jax.random.normal(k4, (2, 3, 10, 7), dtype=jnp.float32) * 0.7 - 0.1
    out2 = jax.block_until_ready(style_loss(x2, t2))
    ref2 = _style_loss_ref(x2, t2)
    assert jnp.allclose(out2, ref2, rtol=1e-4, atol=1e-6), (out2, ref2)

    # 3) Spatial tail masking: HW=2500 > 2048 -> two spatial blocks, ragged tail;
    #    also exercises >=2 row blocks (NC=16) and the edge-row mask.
    x3 = jax.random.normal(k5, (1, 16, 50, 50), dtype=jnp.float32)
    t3 = jax.random.normal(k6, (1, 16, 50, 50), dtype=jnp.float32) * 0.9 + 0.3
    out3 = jax.block_until_ready(style_loss(x3, t3))
    ref3 = _style_loss_ref(x3, t3)
    assert jnp.allclose(out3, ref3, rtol=1e-4, atol=1e-6), (out3, ref3)

    # 4) bf16 inputs exercise the MXU lane-reduction path.
    x4 = jax.random.normal(k7, (2, 8, 32, 36), dtype=jnp.float32).astype(jnp.bfloat16)
    t4 = (jax.random.normal(k8, (2, 8, 32, 36), dtype=jnp.float32) * 1.1 + 0.1
          ).astype(jnp.bfloat16)
    out4 = jax.block_until_ready(style_loss(x4, t4))
    ref4 = _style_loss_ref(x4.astype(jnp.float32), t4.astype(jnp.float32))
    assert jnp.allclose(out4, ref4, rtol=2e-3, atol=1e-5), (out4, ref4)

    print("KERNEL_OK")
</pallas_src>

<mosaic_0001>
module attributes {stable_mosaic.version = 11 : i64} {
  func.func @_style_loss_kernel(%arg0: i32, %arg1: i32, %arg2: memref<8x256xf32, #tpu.memory_space<vmem>>, %arg3: memref<8x256xf32, #tpu.memory_space<vmem>>, %arg4: memref<1x1x128xf32, #tpu.memory_space<vmem>>, %arg5: memref<8x1xf32, #tpu.memory_space<vmem>>, %arg6: memref<8x1xf32, #tpu.memory_space<vmem>>, %arg7: memref<8x1xf32, #tpu.memory_space<vmem>>, %arg8: memref<8x1xf32, #tpu.memory_space<vmem>>) attributes {dimension_semantics = [#tpu.dimension_semantics<parallel>, #tpu.dimension_semantics<arbitrary>], iteration_bounds = array<i64: 1, 1>, scalar_prefetch = 0 : i64, scratch_operands = 4 : i64, tpu.core_type = #tpu.core_type<tc>, window_params = [{transform_indices = @transform_0, window_bounds = array<i64: 8, 256>}, {transform_indices = @transform_1, window_bounds = array<i64: 8, 256>}, {transform_indices = @transform_2, window_bounds = array<i64: 1, 1, 128>}]} {
    %c0_i32 = arith.constant 0 : i32
    %0 = arith.cmpi eq, %arg1, %c0_i32 : i32
    %1 = arith.extui %0 : i1 to i32
    %c0_i32_0 = arith.constant 0 : i32
    %2 = arith.cmpi ne, %1, %c0_i32_0 : i32
    scf.if %2 {
      %cst_25 = arith.constant 0.000000e+00 : f32
      %30 = vector.broadcast %cst_25 : f32 to vector<8x1xf32>
      %c0_26 = arith.constant 0 : index
      %c0_27 = arith.constant 0 : index
      %31 = vector.load %arg5[%c0_26, %c0_27] : memref<8x1xf32, #tpu.memory_space<vmem>>, vector<8x1xf32>
      tpu.vector_store %arg5[%c0_26, %c0_27], %30 {strides = array<i32>} : memref<8x1xf32, #tpu.memory_space<vmem>>, vector<8x1xf32>,
      %cst_28 = arith.constant 0.000000e+00 : f32
      %32 = vector.broadcast %cst_28 : f32 to vector<8x1xf32>
      %c0_29 = arith.constant 0 : index
      %c0_30 = arith.constant 0 : index
      %33 = vector.load %arg6[%c0_29, %c0_30] : memref<8x1xf32, #tpu.memory_space<vmem>>, vector<8x1xf32>
      tpu.vector_store %arg6[%c0_29, %c0_30], %32 {strides = array<i32>} : memref<8x1xf32, #tpu.memory_space<vmem>>, vector<8x1xf32>,
      %cst_31 = arith.constant 0.000000e+00 : f32
      %34 = vector.broadcast %cst_31 : f32 to vector<8x1xf32>
      %c0_32 = arith.constant 0 : index
      %c0_33 = arith.constant 0 : index
      %35 = vector.load %arg7[%c0_32, %c0_33] : memref<8x1xf32, #tpu.memory_space<vmem>>, vector<8x1xf32>
      tpu.vector_store %arg7[%c0_32, %c0_33], %34 {strides = array<i32>} : memref<8x1xf32, #tpu.memory_space<vmem>>, vector<8x1xf32>,
      %cst_34 = arith.constant 0.000000e+00 : f32
      %36 = vector.broadcast %cst_34 : f32 to vector<8x1xf32>
      %c0_35 = arith.constant 0 : index
      %c0_36 = arith.constant 0 : index
      %37 = vector.load %arg8[%c0_35, %c0_36] : memref<8x1xf32, #tpu.memory_space<vmem>>, vector<8x1xf32>
      tpu.vector_store %arg8[%c0_35, %c0_36], %36 {strides = array<i32>} : memref<8x1xf32, #tpu.memory_space<vmem>>, vector<8x1xf32>,
    } else {
    }
    %c0 = arith.constant 0 : index
    %c0_1 = arith.constant 0 : index
    %3 = vector.load %arg2[%c0, %c0_1] : memref<8x256xf32, #tpu.memory_space<vmem>>, vector<8x256xf32>
    %c0_2 = arith.constant 0 : index
    %c0_3 = arith.constant 0 : index
    %4 = vector.load %arg3[%c0_2, %c0_3] : memref<8x256xf32, #tpu.memory_space<vmem>>, vector<8x256xf32>
    %c0_4 = arith.constant 0 : index
    %c0_5 = arith.constant 0 : index
    %5 = vector.load %arg5[%c0_4, %c0_5] : memref<8x1xf32, #tpu.memory_space<vmem>>, vector<8x1xf32>
    %cst = arith.constant dense<0.000000e+00> : vector<8xf32>
    %6 = vector.multi_reduction <add>, %3, %cst [1] : vector<8x256xf32> to vector<8xf32>
    %7 = vector.shape_cast %6 : vector<8xf32> to vector<8x1xf32>
    %8 = arith.addf %5, %7 : vector<8x1xf32>
    %c0_6 = arith.constant 0 : index
    %c0_7 = arith.constant 0 : index
    %9 = vector.load %arg5[%c0_6, %c0_7] : memref<8x1xf32, #tpu.memory_space<vmem>>, vector<8x1xf32>
    tpu.vector_store %arg5[%c0_6, %c0_7], %8 {strides = array<i32>} : memref<8x1xf32, #tpu.memory_space<vmem>>, vector<8x1xf32>,
    %c0_8 = arith.constant 0 : index
    %c0_9 = arith.constant 0 : index
    %10 = vector.load %arg7[%c0_8, %c0_9] : memref<8x1xf32, #tpu.memory_space<vmem>>, vector<8x1xf32>
    %cst_10 = arith.constant dense<0.000000e+00> : vector<8xf32>
    %11 = vector.multi_reduction <add>, %4, %cst_10 [1] : vector<8x256xf32> to vector<8xf32>
    %12 = vector.shape_cast %11 : vector<8xf32> to vector<8x1xf32>
    %13 = arith.addf %10, %12 : vector<8x1xf32>
    %c0_11 = arith.constant 0 : index
    %c0_12 = arith.constant 0 : index
    %14 = vector.load %arg7[%c0_11, %c0_12] : memref<8x1xf32, #tpu.memory_space<vmem>>, vector<8x1xf32>
    tpu.vector_store %arg7[%c0_11, %c0_12], %13 {strides = array<i32>} : memref<8x1xf32, #tpu.memory_space<vmem>>, vector<8x1xf32>,
    %c0_13 = arith.constant 0 : index
    %c0_14 = arith.constant 0 : index
    %15 = vector.load %arg6[%c0_13, %c0_14] : memref<8x1xf32, #tpu.memory_space<vmem>>, vector<8x1xf32>
    %16 = arith.mulf %3, %3 : vector<8x256xf32>
    %cst_15 = arith.constant dense<0.000000e+00> : vector<8xf32>
    %17 = vector.multi_reduction <add>, %16, %cst_15 [1] : vector<8x256xf32> to vector<8xf32>
    %18 = vector.shape_cast %17 : vector<8xf32> to vector<8x1xf32>
    %19 = arith.addf %15, %18 : vector<8x1xf32>
    %c0_16 = arith.constant 0 : index
    %c0_17 = arith.constant 0 : index
    %20 = vector.load %arg6[%c0_16, %c0_17] : memref<8x1xf32, #tpu.memory_space<vmem>>, vector<8x1xf32>
    tpu.vector_store %arg6[%c0_16, %c0_17], %19 {strides = array<i32>} : memref<8x1xf32, #tpu.memory_space<vmem>>, vector<8x1xf32>,
    %c0_18 = arith.constant 0 : index
    %c0_19 = arith.constant 0 : index
    %21 = vector.load %arg8[%c0_18, %c0_19] : memref<8x1xf32, #tpu.memory_space<vmem>>, vector<8x1xf32>
    %22 = arith.mulf %4, %4 : vector<8x256xf32>
    %cst_20 = arith.constant dense<0.000000e+00> : vector<8xf32>
    %23 = vector.multi_reduction <add>, %22, %cst_20 [1] : vector<8x256xf32> to vector<8xf32>
    %24 = vector.shape_cast %23 : vector<8xf32> to vector<8x1xf32>
    %25 = arith.addf %21, %24 : vector<8x1xf32>
    %c0_21 = arith.constant 0 : index
    %c0_22 = arith.constant 0 : index
    %26 = vector.load %arg8[%c0_21, %c0_22] : memref<8x1xf32, #tpu.memory_space<vmem>>, vector<8x1xf32>
    tpu.vector_store %arg8[%c0_21, %c0_22], %25 {strides = array<i32>} : memref<8x1xf32, #tpu.memory_space<vmem>>, vector<8x1xf32>,
    %c0_i32_23 = arith.constant 0 : i32
    %27 = arith.cmpi eq, %arg1, %c0_i32_23 : i32
    %28 = arith.extui %27 : i1 to i32
    %c0_i32_24 = arith.constant 0 : i32
    %29 = arith.cmpi ne, %28, %c0_i32_24 : i32
    scf.if %29 {
      %c0_25 = arith.constant 0 : index
      %c0_26 = arith.constant 0 : index
      %30 = vector.load %arg5[%c0_25, %c0_26] : memref<8x1xf32, #tpu.memory_space<vmem>>, vector<8x1xf32>
      %c0_27 = arith.constant 0 : index
      %c0_28 = arith.constant 0 : index
      %31 = vector.load %arg7[%c0_27, %c0_28] : memref<8x1xf32, #tpu.memory_space<vmem>>, vector<8x1xf32>
      %cst_29 = arith.constant 3.906250e-03 : f32
      %32 = vector.broadcast %cst_29 : f32 to vector<8x1xf32>
      %33 = arith.mulf %30, %32 : vector<8x1xf32>
      %cst_30 = arith.constant 3.906250e-03 : f32
      %34 = vector.broadcast %cst_30 : f32 to vector<8x1xf32>
      %35 = arith.mulf %31, %34 : vector<8x1xf32>
      %c0_31 = arith.constant 0 : index
      %c0_32 = arith.constant 0 : index
      %36 = vector.load %arg6[%c0_31, %c0_32] : memref<8x1xf32, #tpu.memory_space<vmem>>, vector<8x1xf32>
      %37 = arith.mulf %30, %33 : vector<8x1xf32>
      %38 = arith.subf %36, %37 : vector<8x1xf32>
      %cst_33 = arith.constant 0.000000e+00 : f32
      %39 = vector.broadcast %cst_33 : f32 to vector<8x1xf32>
      %40 = arith.maximumf %38, %39 : vector<8x1xf32>
      %cst_34 = arith.constant 0.00392156886 : f32
      %41 = vector.broadcast %cst_34 : f32 to vector<8x1xf32>
      %42 = arith.mulf %40, %41 : vector<8x1xf32>
      %cst_35 = arith.constant 9.99999974E-6 : f32
      %43 = vector.broadcast %cst_35 : f32 to vector<8x1xf32>
      %44 = arith.addf %42, %43 : vector<8x1xf32>
      %c0_36 = arith.constant 0 : index
      %c0_37 = arith.constant 0 : index
      %45 = vector.load %arg8[%c0_36, %c0_37] : memref<8x1xf32, #tpu.memory_space<vmem>>, vector<8x1xf32>
      %46 = arith.mulf %31, %35 : vector<8x1xf32>
      %47 = arith.subf %45, %46 : vector<8x1xf32>
      %cst_38 = arith.constant 0.000000e+00 : f32
      %48 = vector.broadcast %cst_38 : f32 to vector<8x1xf32>
      %49 = arith.maximumf %47, %48 : vector<8x1xf32>
      %cst_39 = arith.constant 0.00392156886 : f32
      %50 = vector.broadcast %cst_39 : f32 to vector<8x1xf32>
      %51 = arith.mulf %49, %50 : vector<8x1xf32>
      %cst_40 = arith.constant 9.99999974E-6 : f32
      %52 = vector.broadcast %cst_40 : f32 to vector<8x1xf32>
      %53 = arith.addf %51, %52 : vector<8x1xf32>
      %54 = math.sqrt %44 : vector<8x1xf32>
      %55 = math.sqrt %53 : vector<8x1xf32>
      %56 = arith.subf %33, %35 : vector<8x1xf32>
      %57 = arith.subf %54, %55 : vector<8x1xf32>
      %58 = arith.mulf %56, %56 : vector<8x1xf32>
      %59 = arith.mulf %57, %57 : vector<8x1xf32>
      %60 = arith.addf %58, %59 : vector<8x1xf32>
      %c8_i32 = arith.constant 8 : i32
      %61 = arith.muli %arg0, %c8_i32 : i32
      %62 = tpu.iota {dimensions = array<i32: 0>} : vector<8x1xi32>
      %63 = vector.broadcast %61 : i32 to vector<8x1xi32>
      %64 = arith.addi %63, %62 : vector<8x1xi32>
      %c8_i32_41 = arith.constant 8 : i32
      %65 = vector.broadcast %c8_i32_41 : i32 to vector<8x1xi32>
      %66 = arith.cmpi slt, %64, %65 : vector<8x1xi32>
      %cst_42 = arith.constant 0.000000e+00 : f32
      %67 = vector.broadcast %cst_42 : f32 to vector<8x1xf32>
      %68 = arith.select %66, %60, %67 : vector<8x1xi1>, vector<8x1xf32>
      %cst_43 = arith.constant dense<0.000000e+00> : vector<1xf32>
      %69 = vector.multi_reduction <add>, %68, %cst_43 [0] : vector<8x1xf32> to vector<1xf32>
      %70 = vector.shape_cast %69 : vector<1xf32> to vector<1x1xf32>
      %71 = tpu.iota {dimensions = array<i32: 1>} : vector<1x128xi32>
      %c0_i32_44 = arith.constant 0 : i32
      %72 = vector.broadcast %c0_i32_44 : i32 to vector<1x128xi32>
      %73 = arith.cmpi eq, %71, %72 : vector<1x128xi32>
      %cst_45 = arith.constant 0.000000e+00 : f32
      %74 = vector.shape_cast %70 : vector<1x1xf32> to vector<1x1xf32>
      %75 = vector.broadcast %74 : vector<1x1xf32> to vector<1x128xf32>
      %76 = vector.broadcast %cst_45 : f32 to vector<1x128xf32>
      %77 = arith.select %73, %75, %76 : vector<1x128xi1>, vector<1x128xf32>
      %78 = vector.shape_cast %77 : vector<1x128xf32> to vector<1x1x128xf32>
      %c0_46 = arith.constant 0 : index
      %c0_47 = arith.constant 0 : index
      %c0_48 = arith.constant 0 : index
      %79 = vector.load %arg4[%c0_46, %c0_47, %c0_48] : memref<1x1x128xf32, #tpu.memory_space<vmem>>, vector<1x1x128xf32>
      tpu.vector_store %arg4[%c0_46, %c0_47, %c0_48], %78 {strides = array<i32>} : memref<1x1x128xf32, #tpu.memory_space<vmem>>, vector<1x1x128xf32>,
    } else {
    }
    return
  }
  func.func @transform_0(%arg0: i32, %arg1: i32) -> (i32, i32) {
    %c0_i32 = arith.constant 0 : i32
    return %arg0, %arg1 : i32, i32
  }
  func.func @transform_1(%arg0: i32, %arg1: i32) -> (i32, i32) {
    %c0_i32 = arith.constant 0 : i32
    return %arg0, %arg1 : i32, i32
  }
  func.func @transform_2(%arg0: i32, %arg1: i32) -> (i32, i32, i32) {
    %c0_i32 = arith.constant 0 : i32
    %c0_i32_0 = arith.constant 0 : i32
    %c0_i32_1 = arith.constant 0 : i32
    return %arg0, %c0_i32, %c0_i32_0 : i32, i32, i32
  }
}

</mosaic_0001>

<bundles_post_ra>
// kernel: tpu_custom_call.1
= control target key start
LH: loop header
LB: loop body
LE: loop exit
PB: predicated region body
PF: predicated region fallthrough
CT: control target
= control target key end

     0   :  { %7 = vsyncpa [#allocation7], 0  ;;  %s270_s0 = inlined_call_operand.hbm [shape: f32[8,256], index: 0, kind: input, shape index: {}]   ;;  %s271_s1 = inlined_call_operand.hbm [shape: f32[8,256], index: 1, kind: input, shape index: {}]   ;;  %s272_s2 = inlined_call_operand.hbm [shape: f32[1,1,128], index: 2, kind: output, shape index: {}]  }
   0x1   :  { %8 = vsyncpa [#allocation10], 0 }
   0x2   :  { %9 = vsyncpa [#allocation8], 0  ;;  %s232_s9 = smov [#allocation6]   ;;  %s233_s11 = smov [#allocation9]  }
   0x3   :  { %s16_s10 = sshll.u32 %s232_s9, 4  ;;  %s26_s12 = sshll.u32 %s233_s11, 4  ;;  %s17_s10 = int_to_ptr.vmem [resolvable:$true] %s16_s10  ;;  %s27_s12 = int_to_ptr.vmem [resolvable:$true] %s26_s12 }
   0x4   :  { %s174_s13 = scalar_lea.vmem %s17_s10, 256  ;;  %p179_p1 = scmp.lt.s32.totalorder %s17_s10, %s17_s10 }
   0x5   :  { %p175_p0 = scmp.ne.s32.totalorder %s17_s10, %s174_s13  ;;  %p180_p2 = scmp.lt.s32.totalorder %s174_s13, %s174_s13 }
   0x7   :  { %p181_p3 = por %p180_p2, %p179_p1 }
   0x9   :  { %p182_p4 = pnand %p181_p3, %p175_p0 }
   0xb   :  { %185 = shalt.err (!%p182_p4)
}
   0xc   :  { %19 = dma.hbm_to_vmem [thread:$0]  %s270_s0, 256, %s17_s10, [#allocation7]  }
   0xd   :  { %s194_s16 = scalar_lea.vmem %s27_s12, 256  ;;  %p199_p6 = scmp.lt.s32.totalorder %s27_s12, %s27_s12 }
   0xe   :  { %p195_p5 = scmp.ne.s32.totalorder %s27_s12, %s194_s16  ;;  %p200_p7 = scmp.lt.s32.totalorder %s194_s16, %s194_s16 }
  0x10   :  { %p201_p8 = por %p200_p7, %p199_p6 }
  0x12   :  { %p202_p9 = pnand %p201_p8, %p195_p5 }
  0x14   :  { %205 = shalt.err (!%p202_p9)
}
  0x15   :  { %29 = dma.hbm_to_vmem [thread:$0]  %s271_s1, 256, %s27_s12, [#allocation10]  }
  0x16   :  { %226 = dma.done.wait [#allocation7], 256  }
  0x17   :  { %227 = vsyncadd [#allocation7], 4294967040 }
  0x18   :  { %228 = dma.done.wait [#allocation10], 256  }
  0x19   :  { %229 = vsyncadd [#allocation10], 4294967040  ;;  %vm40_vm0 = vcmask 7168   ;;  %v234_v0 = vmov 0.0   ;;  %v45_v1 = vld [vmem:[#allocation6] sm:$0xff]  ;;  %v46_v2 = vld [vmem:[#allocation6 + $0x8] sm:$0xff] }
  0x1a   :  { %41 = vst.msk [vmem:[#allocation2] sm:$0xff] %vm40_vm0, %v234_v0  ;;  %42 = vst.msk [vmem:[#allocation3] sm:$0xff] %vm40_vm0, %v234_v0  ;;  %v47_v3 = vld [vmem:[#allocation9] sm:$0xff]  ;;  %v50_v4 = vadd.f32 %v46_v2, %v45_v1  ;;  %v63_v5 = vmul.f32 %v45_v1, %v45_v1  ;;  %v64_v6 = vmul.f32 %v46_v2, %v46_v2  ;;  %v48_v7 = vld [vmem:[#allocation9 + $0x8] sm:$0xff]  ;;  %v235_v13 = vmov 0   ;;  %s236_s0 = smov [#allocation11]  }
  0x1b   :  { %43 = vst.msk [vmem:[#allocation4] sm:$0xff] %vm40_vm0, %v234_v0  ;;  %44 = vst.msk [vmem:[#allocation5] sm:$0xff] %vm40_vm0, %v234_v0  ;;  %v71_v8 = vmul.f32 %v47_v3, %v47_v3  ;;  %v72_v9 = vmul.f32 %v48_v7, %v48_v7  ;;  %v57_v11 = vadd.f32 %v48_v7, %v47_v3  ;;  %161 = vset.pattern.permute.xlu0 %v235_v13  ;;  %v130_v0 = vlaneseq  ;;  %s146_s1 = sshll.u32 %s236_s0, 4  ;;  %s147_s1 = int_to_ptr.vmem [resolvable:$true] %s146_s1 }
  0x1c   :  { %51 = vadd.xlane.f32.xlu0 %v50_v4  ;;  %v65_v10 = vadd.f32 %v64_v6, %v63_v5  ;;  %s206_s19 = scalar_lea.vmem %s147_s1, 16  ;;  %s210_s20 = scalar_lea.vmem %s147_s1, 32 }
  0x1d   :  { %v73_v12 = vadd.f32 %v72_v9, %v71_v8  ;;  %v131_v1 = vand.u32 127, %v130_v0  ;;  %p207_p10 = scmp.ne.s32.totalorder %s147_s1, %s206_s19  ;;  %p211_p11 = scmp.lt.s32.totalorder %s147_s1, %s147_s1 }
  0x1e   :  { %66 = vadd.xlane.f32.xlu1 %v65_v10  ;;  %p212_p12 = scmp.lt.s32.totalorder %s210_s20, %s206_s19 }
  0x1f   :  { %vm132_vm5 = vcmp.eq.s32.totalorder %v131_v1, 0 }
  0x20   :  { %58 = vadd.xlane.f32.xlu0 %v57_v11  ;;  %p213_p13 = por %p212_p12, %p211_p11 }
  0x21   :  { %v49_v14 = vld [vmem:[#allocation2] sm:$0xff]  ;;  %v62_v16 = vld [vmem:[#allocation3] sm:$0xff] }
  0x22   :  { %74 = vadd.xlane.f32.xlu1 %v73_v12  ;;  %v56_v19 = vld [vmem:[#allocation4] sm:$0xff]  ;;  %v70_v22 = vld [vmem:[#allocation5] sm:$0xff]  ;;  %p214_p0 = pnand %p213_p13, %p207_p10 }
  0xa5   :  { %v52_v15 = vpop.xlane.xlu0 %51 }
  0xa6   :  { %v53_v17 = vadd.f32 %v52_v15, %v49_v14 }
  0xa7   :  { %v67_v18 = vpop.xlane.xlu1 %66 }
  0xa8   :  { %55 = vst.msk [vmem:[#allocation2] sm:$0xff] %vm40_vm0, %v53_v17  ;;  %v68_v20 = vadd.f32 %v67_v18, %v62_v16 }
  0xa9   :  { %v59_v21 = vpop.xlane.xlu0 %58 }
  0xaa   :  { %69 = vst.msk [vmem:[#allocation3] sm:$0xff] %vm40_vm0, %v68_v20  ;;  %v60_v23 = vadd.f32 %v59_v21, %v56_v19 }
  0xab   :  { %v75_v24 = vpop.xlane.xlu1 %74 }
  0xac   :  { %61 = vst.msk [vmem:[#allocation4] sm:$0xff] %vm40_vm0, %v60_v23  ;;  %v76_v25 = vadd.f32 %v75_v24, %v70_v22 }
  0xae   :  { %77 = vst.msk [vmem:[#allocation5] sm:$0xff] %vm40_vm0, %v76_v25 }
  0xaf   :  { %v81_v26 = vld [vmem:[#allocation2] sm:$0xff] }
  0xb0   :  { %v83_v27 = vmul.f32 0.00390625, %v81_v26 }
  0xb1   :  { %v85_v28 = vld [vmem:[#allocation3] sm:$0xff] }
  0xb2   :  { %v86_v29 = vmul.f32 %v83_v27, %v81_v26 }
  0xb3   :  { %v82_v30 = vld [vmem:[#allocation4] sm:$0xff] }
  0xb4   :  { %v84_v31 = vmul.f32 0.00390625, %v82_v30  ;;  %v87_v32 = vsub.f32 %v85_v28, %v86_v29 }
  0xb5   :  { %v91_v33 = vld [vmem:[#allocation5] sm:$0xff] }
  0xb6   :  { %v88_v34 = vmax.f32 %v87_v32, 0.0  ;;  %v92_v35 = vmul.f32 %v84_v31, %v82_v30  ;;  %v111_v50 = vsub.f32 %v83_v27, %v84_v31 }
  0xb8   :  { %v89_v36 = vmul.f32 0.003921569, %v88_v34  ;;  %v93_v37 = vsub.f32 %v91_v33, %v92_v35  ;;  %v113_v54 = vmul.f32 %v111_v50, %v111_v50 }
  0xba   :  { %v90_v38 = vadd.f32 1e-05, %v89_v36  ;;  %v94_v39 = vmax.f32 %v93_v37, 0.0 }
  0xbc   :  { %v95_v40 = vmul.f32 0.003921569, %v94_v39  ;;  %162 = vrsqrt.f32 %v90_v38  ;;  %vm99_vm1 = vcmp.eq.f32.partialorder %v90_v38, inf  ;;  %v102_v47 = vand.u32 2147483648, %v90_v38 }
  0xbd   :  { %vm101_vm3 = vcmp.eq.f32.partialorder %v90_v38, 0.0 }
  0xbe   :  { %v96_v41 = vadd.f32 1e-05, %v95_v40 }
  0xc0   :  { %164 = vrsqrt.f32 %v96_v41  ;;  %vm106_vm2 = vcmp.eq.f32.partialorder %v96_v41, inf  ;;  %v109_v48 = vand.u32 2147483648, %v96_v41  ;;  %vm108_vm4 = vcmp.eq.f32.partialorder %v96_v41, 0.0 }
  0xc9   :  { %v163_v42 = vpop.eup %162 }
  0xca   :  { %v98_v43 = vmul.f32 %v163_v42, %v90_v38 }
  0xcc   :  { %v100_v45 = vsel %vm99_vm1, %v90_v38, %v98_v43 }
  0xcd   :  { %v165_v44 = vpop.eup %164  ;;  %v103_v51 = vsel %vm101_vm3, %v102_v47, %v100_v45 }
  0xce   :  { %v105_v46 = vmul.f32 %v165_v44, %v96_v41 }
  0xd0   :  { %v107_v49 = vsel %vm106_vm2, %v96_v41, %v105_v46 }
  0xd1   :  { %v110_v52 = vsel %vm108_vm4, %v109_v48, %v107_v49 }
  0xd2   :  { %v112_v53 = vsub.f32 %v103_v51, %v110_v52 }
  0xd4   :  { %v114_v55 = vmul.f32 %v112_v53, %v112_v53 }
  0xd6   :  { %v115_v56 = vadd.f32 %v114_v55, %v113_v54 }
  0xd8   :  { %v123_v57 = vsel %vm40_vm0, %v115_v56, 0.0 }
  0xd9   :  { %v124_v58 = vrot.slane %v123_v57, 4 }
  0xdb   :  { %v125_v59 = vadd.f32 %v124_v58, %v123_v57 }
  0xdd   :  { %v126_v60 = vrot.slane %v125_v59, 2 }
  0xdf   :  { %v127_v61 = vadd.f32 %v126_v60, %v125_v59 }
  0xe1   :  { %v128_v62 = vrot.slane %v127_v61, 1 }
  0xe3   :  { %v129_v63 = vadd.f32 %v128_v62, %v127_v61 }
  0xe5   :  { %135 = vperm.xlu0 %161, %v129_v63  }
 0x160   :  { %v136_v2 = vpop.permute.xlu0 %135 }
 0x161   :  { %v138_v3 = vsel %vm132_vm5, %v136_v2, 0.0 }
 0x162   :  { %139 = vst [vmem:[#allocation11] sm:$0x1] %v138_v3 }
 0x163   :  { %217 = shalt.err (!%p214_p0)
}
 0x164   :  { %149 = dma.vmem_to_hbm [thread:$0]  %s147_s1, 16, %s272_s2, [#allocation8]  }
 0x165   :  { %230 = dma.done.wait [#allocation8], 16  }
 0x166   :  { %231 = vsyncadd [#allocation8], 4294967280 }
 0x167   :  { %153 = vsyncpa [#allocation7], 1 }
 0x168   :  { %154 = vsyncpa [#allocation10], 1 }
 0x169   :  { %155 = vsyncpa [#allocation8], 1 }

</bundles_post_ra>
